<compile_context>
chip_gen: v5e
topology: v5e:2x2
jax: 0.10.0
libtpu: 0.0.40
codegen_flags: <defaults>
</compile_context>

<pallas_src>
import jax
import jax.numpy as jnp
from jax import lax
from jax.experimental import pallas as pl
from jax.experimental.pallas import tpu as pltpu


def _fused_lstm_stack_kernel(x_ref, s_ref, w_ref, b_ref, out_ref):
    """All LSTM cells of the stack, one timestep, fully VMEM-resident.

    x_ref:   (B, D_in)                 input activation
    s_ref:   (B, 2*L*H)                state slab  [h_0..h_{L-1} | c_0..c_{L-1}]
    w_ref:   (L, Kmax, 4H)             per-cell [W_ih^T ; W_hh^T], zero-padded to Kmax rows
    b_ref:   (L, 1, 4H)                per-cell fused bias (b_ih + b_hh)
    out_ref: (B, 2*L*H)                new state slab (same layout as s_ref)
    """
    L, k_max, gate_w = w_ref.shape
    hidden = gate_w // 4
    batch = x_ref.shape[0]

    x = x_ref[...].astype(jnp.float32)
    s = s_ref[...].astype(jnp.float32)

    new_h = []
    new_c = []
    # Static Python loop: L is tiny and known at trace time, so this traces to
    # the same code a lax.fori_loop(..., unroll=True) over a layer index would.
    for i in range(L):
        h = s[:, i * hidden:(i + 1) * hidden]
        c = s[:, (L + i) * hidden:(L + i + 1) * hidden]

        # Single combined matmul: [x | h] @ [W_ih^T ; W_hh^T]
        xh = jnp.concatenate([x, h], axis=1)
        pad = k_max - xh.shape[1]
        if pad:
            # Zero-pad to the common contraction depth; padded weight rows are
            # zero too, so this contributes nothing.
            xh = jnp.concatenate([xh, jnp.zeros((batch, pad), jnp.float32)], axis=1)

        gates = (jnp.dot(xh, w_ref[i], preferred_element_type=jnp.float32)
                 + b_ref[i].astype(jnp.float32))

        # Full-width nonlinearities (EUP), selected per lane: tanh only for the
        # g-gate lanes [2H, 3H), sigmoid everywhere else.
        lane = lax.broadcasted_iota(jnp.int32, gates.shape, 1)
        is_g = (lane >= 2 * hidden) & (lane < 3 * hidden)
        act = jnp.where(is_g, jnp.tanh(gates), jax.nn.sigmoid(gates))

        i_g = act[:, 0 * hidden:1 * hidden]
        f_g = act[:, 1 * hidden:2 * hidden]
        g_g = act[:, 2 * hidden:3 * hidden]
        o_g = act[:, 3 * hidden:4 * hidden]

        c_new = f_g * c + i_g * g_g
        h_new = o_g * jnp.tanh(c_new)

        new_h.append(h_new)
        new_c.append(c_new)
        x = h_new  # next cell's input stays in VMEM/vregs

    # One lane-dense store of the whole new state slab.
    out_ref[...] = jnp.concatenate(new_h + new_c, axis=1).astype(out_ref.dtype)


def lstm_cell_transition_forward(inp, state_slab, w_stacked, b_stacked):
    """Fused forward: returns (x, new_state_slab). x == h of the last cell."""
    batch = inp.shape[0]
    L, k_max, gate_w = w_stacked.shape
    hidden = gate_w // 4

    flops = int(2 * batch * k_max * gate_w * L + 10 * batch * gate_w * L)
    transcendentals = int((2 * batch * gate_w + batch * hidden) * L)
    bytes_accessed = int(4 * (inp.size + 2 * state_slab.size
                              + w_stacked.size + b_stacked.size))

    vmem = pl.BlockSpec(memory_space=pltpu.MemorySpace.VMEM)
    out_slab = pl.pallas_call(
        _fused_lstm_stack_kernel,
        out_shape=jax.ShapeDtypeStruct(state_slab.shape, state_slab.dtype),
        in_specs=[vmem, vmem, vmem, vmem],
        out_specs=vmem,
        # Update the state slab "in place" (input 1 -> output 0).
        input_output_aliases={1: 0},
        cost_estimate=pl.CostEstimate(flops=flops,
                                      transcendentals=transcendentals,
                                      bytes_accessed=bytes_accessed),
        # No grid: the whole (tiny) problem is a single VMEM-resident tile, so
        # dimension_semantics is moot.  At larger batch, add a leading
        # "parallel" batch-shard grid axis (cell chain stays serial).
    )(inp, state_slab, w_stacked, b_stacked)

    x = out_slab[:, (L - 1) * hidden: L * hidden]
    return x, out_slab


# ------------------------- parameter / state helpers -------------------------

def init_params(key, input_size, hidden_size, num_cells, dtype=jnp.float32):
    """Deterministic synthetic parameters in torch.nn.LSTMCell shapes:
       weight_ih: (4H, in), weight_hh: (4H, H), bias_ih / bias_hh: (4H,)."""
    params = []
    d_in = input_size
    for _ in range(num_cells):
        key, k1, k2, k3, k4 = jax.random.split(key, 5)
        scale = 1.0 / jnp.sqrt(hidden_size)
        w_ih = jax.random.uniform(k1, (4 * hidden_size, d_in), dtype, -scale, scale)
        w_hh = jax.random.uniform(k2, (4 * hidden_size, hidden_size), dtype, -scale, scale)
        b_ih = jax.random.uniform(k3, (4 * hidden_size,), dtype, -scale, scale)
        b_hh = jax.random.uniform(k4, (4 * hidden_size,), dtype, -scale, scale)
        params.append(dict(w_ih=w_ih, w_hh=w_hh, b_ih=b_ih, b_hh=b_hh))
        d_in = hidden_size
    return params


def pack_params(params, dtype=jnp.float32):
    """One-time packing (hoisted out of forward): transpose, fuse [W_ih^T;W_hh^T],
       zero-pad to a common contraction depth, stack across cells; fuse biases."""
    hidden = params[0]["w_hh"].shape[-1]
    k_sizes = [p["w_ih"].shape[1] + hidden for p in params]
    k_max = max(k_sizes)
    ws, bs = [], []
    for p in params:
        w_cat = jnp.concatenate([p["w_ih"].T, p["w_hh"].T], axis=0)  # (d_in+H, 4H)
        pad = k_max - w_cat.shape[0]
        if pad:
            w_cat = jnp.concatenate(
                [w_cat, jnp.zeros((pad, 4 * hidden), w_cat.dtype)], axis=0)
        ws.append(w_cat)
        bs.append((p["b_ih"] + p["b_hh"]).reshape(1, 4 * hidden))
    return jnp.stack(ws).astype(dtype), jnp.stack(bs).astype(dtype)


def get_init_state(batsize, hidden_size, num_cells, dtype=jnp.float32):
    """State slab (B, 2*L*H): [h_0 .. h_{L-1} | c_0 .. c_{L-1}], all zeros.
       (h_dropout/c_dropout == Dropout(0.0)(ones) == ones -> identity, folded away.)"""
    return jnp.zeros((batsize, 2 * num_cells * hidden_size), dtype)


def unpack_states(state_slab, num_cells, hidden_size):
    L, H = num_cells, hidden_size
    return [dict(h=state_slab[:, i * H:(i + 1) * H],
                 c=state_slab[:, (L + i) * H:(L + i + 1) * H]) for i in range(L)]


# --------------------------------- reference ---------------------------------

def _reference_forward(inp, state_slab, params):
    """Pure-JAX reference (torch LSTMCell math)."""
    L = len(params)
    H = params[0]["w_hh"].shape[-1]
    x = inp
    hs, cs = [], []
    for i, p in enumerate(params):
        h = state_slab[:, i * H:(i + 1) * H]
        c = state_slab[:, (L + i) * H:(L + i + 1) * H]
        gates = x @ p["w_ih"].T + p["b_ih"] + h @ p["w_hh"].T + p["b_hh"]
        i_g = jax.nn.sigmoid(gates[:, 0 * H:1 * H])
        f_g = jax.nn.sigmoid(gates[:, 1 * H:2 * H])
        g_g = jnp.tanh(gates[:, 2 * H:3 * H])
        o_g = jax.nn.sigmoid(gates[:, 3 * H:4 * H])
        c_new = f_g * c + i_g * g_g
        h_new = o_g * jnp.tanh(c_new)
        hs.append(h_new)
        cs.append(c_new)
        x = h_new
    return x, jnp.concatenate(hs + cs, axis=1)


if __name__ == "__main__":
    BATCH = 8
    INPUT_SIZE = 32
    HIDDEN = 32
    NUM_CELLS = 2

    key = jax.random.PRNGKey(0)
    key, k_inp = jax.random.split(key)
    inp = jax.random.normal(k_inp, (BATCH, INPUT_SIZE), jnp.float32)

    params = init_params(key, INPUT_SIZE, HIDDEN, NUM_CELLS)
    w_stacked, b_stacked = pack_params(params)          # hoisted: done once
    state_slab = get_init_state(BATCH, HIDDEN, NUM_CELLS)

    fwd = jax.jit(lstm_cell_transition_forward)
    out, new_slab = fwd(inp, state_slab, w_stacked, b_stacked)
    out = jax.block_until_ready(out)
    new_slab = jax.block_until_ready(new_slab)

    ref_x, ref_slab = _reference_forward(
        inp, get_init_state(BATCH, HIDDEN, NUM_CELLS), params)
    assert jnp.allclose(out, ref_x, atol=1e-5, rtol=1e-5), "x mismatch vs reference"
    assert jnp.allclose(new_slab, ref_slab, atol=1e-5, rtol=1e-5), "state mismatch vs reference"

    print("KERNEL_OK")
</pallas_src>

<mosaic_0001>
module attributes {stable_mosaic.version = 11 : i64} {
  func.func @_fused_lstm_stack_kernel(%arg0: memref<8x32xf32, #tpu.memory_space<vmem>>, %arg1: memref<8x128xf32, #tpu.memory_space<vmem>>, %arg2: memref<2x64x128xf32, #tpu.memory_space<vmem>>, %arg3: memref<2x1x128xf32, #tpu.memory_space<vmem>>, %arg4: memref<8x128xf32, #tpu.memory_space<vmem>>) attributes {dimension_semantics = [], scalar_prefetch = 0 : i64, scratch_operands = 0 : i64, tpu.core_type = #tpu.core_type<tc>} {
    %c0 = arith.constant 0 : index
    %c0_0 = arith.constant 0 : index
    %0 = vector.load %arg0[%c0, %c0_0] : memref<8x32xf32, #tpu.memory_space<vmem>>, vector<8x32xf32>
    %c0_1 = arith.constant 0 : index
    %c0_2 = arith.constant 0 : index
    %1 = vector.load %arg1[%c0_1, %c0_2] : memref<8x128xf32, #tpu.memory_space<vmem>>, vector<8x128xf32>
    %2 = vector.extract_strided_slice %1 {offsets = [0, 0], sizes = [8, 32], strides = [1, 1]} : vector<8x128xf32> to vector<8x32xf32>
    %3 = vector.extract_strided_slice %1 {offsets = [0, 64], sizes = [8, 32], strides = [1, 1]} : vector<8x128xf32> to vector<8x32xf32>
    %4 = tpu.concatenate %0, %2 in 1 : vector<8x32xf32>, vector<8x32xf32> -> vector<8x64xf32>
    %c0_3 = arith.constant 0 : index
    %c0_4 = arith.constant 0 : index
    %c0_5 = arith.constant 0 : index
    %5 = vector.load %arg2[%c0_3, %c0_4, %c0_5] : memref<2x64x128xf32, #tpu.memory_space<vmem>>, vector<1x64x128xf32>
    %6 = vector.shape_cast %5 : vector<1x64x128xf32> to vector<64x128xf32>
    %cst = arith.constant dense<0.000000e+00> : vector<8x128xf32>
    %7 = tpu.matmul %4, %6, %cst {dimension_numbers = #tpu.dot_dimension_numbers<[1], [0], [0], [1], [0, 0, 1, 1], [], []>} : vector<8x64xf32>, vector<64x128xf32>, vector<8x128xf32> -> vector<8x128xf32>
    %c0_6 = arith.constant 0 : index
    %c0_7 = arith.constant 0 : index
    %c0_8 = arith.constant 0 : index
    %8 = vector.load %arg3[%c0_6, %c0_7, %c0_8] : memref<2x1x128xf32, #tpu.memory_space<vmem>>, vector<1x1x128xf32>
    %9 = vector.shape_cast %8 : vector<1x1x128xf32> to vector<1x128xf32>
    %10 = vector.broadcast %9 : vector<1x128xf32> to vector<8x128xf32>
    %11 = arith.addf %7, %10 : vector<8x128xf32>
    %12 = tpu.iota {dimensions = array<i32: 1>} : vector<8x128xi32>
    %c64_i32 = arith.constant 64 : i32
    %13 = vector.broadcast %c64_i32 : i32 to vector<8x128xi32>
    %14 = arith.cmpi sge, %12, %13 : vector<8x128xi32>
    %c96_i32 = arith.constant 96 : i32
    %15 = vector.broadcast %c96_i32 : i32 to vector<8x128xi32>
    %16 = arith.cmpi slt, %12, %15 : vector<8x128xi32>
    %17 = arith.andi %14, %16 : vector<8x128xi1>
    %18 = math.tanh %11 : vector<8x128xf32>
    %19 = arith.negf %11 : vector<8x128xf32>
    %20 = math.exp %19 : vector<8x128xf32>
    %cst_9 = arith.constant 1.000000e+00 : f32
    %21 = vector.broadcast %cst_9 : f32 to vector<8x128xf32>
    %22 = arith.addf %21, %20 : vector<8x128xf32>
    %23 = arith.divf %21, %22 : vector<8x128xf32>
    %24 = arith.select %17, %18, %23 : vector<8x128xi1>, vector<8x128xf32>
    %25 = vector.extract_strided_slice %24 {offsets = [0, 0], sizes = [8, 32], strides = [1, 1]} : vector<8x128xf32> to vector<8x32xf32>
    %26 = vector.extract_strided_slice %24 {offsets = [0, 32], sizes = [8, 32], strides = [1, 1]} : vector<8x128xf32> to vector<8x32xf32>
    %27 = vector.extract_strided_slice %24 {offsets = [0, 64], sizes = [8, 32], strides = [1, 1]} : vector<8x128xf32> to vector<8x32xf32>
    %28 = vector.extract_strided_slice %24 {offsets = [0, 96], sizes = [8, 32], strides = [1, 1]} : vector<8x128xf32> to vector<8x32xf32>
    %29 = arith.mulf %26, %3 : vector<8x32xf32>
    %30 = arith.mulf %25, %27 : vector<8x32xf32>
    %31 = arith.addf %29, %30 : vector<8x32xf32>
    %32 = math.tanh %31 : vector<8x32xf32>
    %33 = arith.mulf %28, %32 : vector<8x32xf32>
    %34 = vector.extract_strided_slice %1 {offsets = [0, 32], sizes = [8, 32], strides = [1, 1]} : vector<8x128xf32> to vector<8x32xf32>
    %35 = vector.extract_strided_slice %1 {offsets = [0, 96], sizes = [8, 32], strides = [1, 1]} : vector<8x128xf32> to vector<8x32xf32>
    %36 = tpu.concatenate %33, %34 in 1 : vector<8x32xf32>, vector<8x32xf32> -> vector<8x64xf32>
    %c1 = arith.constant 1 : index
    %c0_10 = arith.constant 0 : index
    %c0_11 = arith.constant 0 : index
    %37 = vector.load %arg2[%c1, %c0_10, %c0_11] : memref<2x64x128xf32, #tpu.memory_space<vmem>>, vector<1x64x128xf32>
    %38 = vector.shape_cast %37 : vector<1x64x128xf32> to vector<64x128xf32>
    %cst_12 = arith.constant dense<0.000000e+00> : vector<8x128xf32>
    %39 = tpu.matmul %36, %38, %cst_12 {dimension_numbers = #tpu.dot_dimension_numbers<[1], [0], [0], [1], [0, 0, 1, 1], [], []>} : vector<8x64xf32>, vector<64x128xf32>, vector<8x128xf32> -> vector<8x128xf32>
    %c1_13 = arith.constant 1 : index
    %c0_14 = arith.constant 0 : index
    %c0_15 = arith.constant 0 : index
    %40 = vector.load %arg3[%c1_13, %c0_14, %c0_15] : memref<2x1x128xf32, #tpu.memory_space<vmem>>, vector<1x1x128xf32>
    %41 = vector.shape_cast %40 : vector<1x1x128xf32> to vector<1x128xf32>
    %42 = vector.broadcast %41 : vector<1x128xf32> to vector<8x128xf32>
    %43 = arith.addf %39, %42 : vector<8x128xf32>
    %44 = tpu.iota {dimensions = array<i32: 1>} : vector<8x128xi32>
    %c64_i32_16 = arith.constant 64 : i32
    %45 = vector.broadcast %c64_i32_16 : i32 to vector<8x128xi32>
    %46 = arith.cmpi sge, %44, %45 : vector<8x128xi32>
    %c96_i32_17 = arith.constant 96 : i32
    %47 = vector.broadcast %c96_i32_17 : i32 to vector<8x128xi32>
    %48 = arith.cmpi slt, %44, %47 : vector<8x128xi32>
    %49 = arith.andi %46, %48 : vector<8x128xi1>
    %50 = math.tanh %43 : vector<8x128xf32>
    %51 = arith.negf %43 : vector<8x128xf32>
    %52 = math.exp %51 : vector<8x128xf32>
    %cst_18 = arith.constant 1.000000e+00 : f32
    %53 = vector.broadcast %cst_18 : f32 to vector<8x128xf32>
    %54 = arith.addf %53, %52 : vector<8x128xf32>
    %55 = arith.divf %53, %54 : vector<8x128xf32>
    %56 = arith.select %49, %50, %55 : vector<8x128xi1>, vector<8x128xf32>
    %57 = vector.extract_strided_slice %56 {offsets = [0, 0], sizes = [8, 32], strides = [1, 1]} : vector<8x128xf32> to vector<8x32xf32>
    %58 = vector.extract_strided_slice %56 {offsets = [0, 32], sizes = [8, 32], strides = [1, 1]} : vector<8x128xf32> to vector<8x32xf32>
    %59 = vector.extract_strided_slice %56 {offsets = [0, 64], sizes = [8, 32], strides = [1, 1]} : vector<8x128xf32> to vector<8x32xf32>
    %60 = vector.extract_strided_slice %56 {offsets = [0, 96], sizes = [8, 32], strides = [1, 1]} : vector<8x128xf32> to vector<8x32xf32>
    %61 = arith.mulf %58, %35 : vector<8x32xf32>
    %62 = arith.mulf %57, %59 : vector<8x32xf32>
    %63 = arith.addf %61, %62 : vector<8x32xf32>
    %64 = math.tanh %63 : vector<8x32xf32>
    %65 = arith.mulf %60, %64 : vector<8x32xf32>
    %66 = tpu.concatenate %33, %65, %31, %63 in 1 : vector<8x32xf32>, vector<8x32xf32>, vector<8x32xf32>, vector<8x32xf32> -> vector<8x128xf32>
    %c0_19 = arith.constant 0 : index
    %c0_20 = arith.constant 0 : index
    %67 = vector.load %arg4[%c0_19, %c0_20] : memref<8x128xf32, #tpu.memory_space<vmem>>, vector<8x128xf32>
    tpu.vector_store %arg4[%c0_19, %c0_20], %66 {strides = array<i32>} : memref<8x128xf32, #tpu.memory_space<vmem>>, vector<8x128xf32>,
    return
  }
}

</mosaic_0001>

<bundles_post_ra>
// kernel: lstm_cell_transition_forward.1
= control target key start
LH: loop header
LB: loop body
LE: loop exit
PB: predicated region body
PF: predicated region fallthrough
CT: control target
= control target key end

     0   :  { %9 = vsyncpa [#allocation3], 0  ;;  %s409_s0 = inlined_call_operand.vmem [shape: f32[8,32], index: 0, kind: input, shape index: {}]   ;;  %s410_s1 = inlined_call_operand.vmem [shape: f32[8,128], index: 1, kind: input, shape index: {}, may-alias: {1,4}]   ;;  %s411_s2 = inlined_call_operand.hbm [shape: f32[2,64,128], index: 2, kind: input, shape index: {}]   ;;  %s412_s3 = inlined_call_operand.hbm [shape: f32[2,1,128], index: 3, kind: input, shape index: {}]   ;;  %s413_s4 = inlined_call_operand.vmem [shape: f32[8,128], index: 4, kind: output, shape index: {}, may-alias: {1,4}]  }
   0x1   :  { %s19_s17 = sshll.u32 %s411_s2, 4  ;;  %s20_s17 = int_to_ptr.hbm [resolvable:$true] %s19_s17 }
   0x2   :  { %10 = vsyncpa [#allocation5], 0  ;;  %s328_s18 = smov [#allocation2]   ;;  %s32_s22 = sshll.u32 %s412_s3, 4  ;;  %s33_s22 = int_to_ptr.hbm [resolvable:$true] %s32_s22 }
   0x3   :  { %s21_s19 = sshll.u32 %s328_s18, 4  ;;  %s329_s23 = smov 128   ;;  %s22_s19 = int_to_ptr.vmem [resolvable:$true] %s21_s19 }
   0x4   :  { %s330_s24 = smov 8   ;;  %s331_s25 = smov [#allocation4]  }
   0x5   :  { %27 = dma.hbm_to_vmem [thread:$0]  %s20_s17, 2048, %s22_s19, [#allocation3], %s329_s23, %s329_s23, %s330_s24  }
   0x6   :  { %s34_s26 = sshll.u32 %s331_s25, 4  ;;  %s332_s27 = smov 16   ;;  %s35_s26 = int_to_ptr.vmem [resolvable:$true] %s34_s26 }
   0x7   :  { %s333_s28 = smov 1  }
   0x8   :  { %40 = dma.hbm_to_vmem [thread:$0]  %s33_s22, 32, %s35_s26, [#allocation5], %s332_s27, %s332_s27, %s333_s28  }
   0x9   :  { %324 = dma.done.wait [#allocation3], 2048  }
   0xa   :  { %325 = vsyncadd [#allocation3], 4294965248 }
   0xb   :  { %326 = dma.done.wait [#allocation5], 32  }
   0xc   :  { %327 = vsyncadd [#allocation5], 4294967264  ;;  %v371_v0 = vld [vmem:[%s410_s1] sm:$0xff]  ;;  %v64_v1 = vld [vmem:[#allocation2 + $0x38] sm:$0xff]  ;;  %s334_s3 = smov 32   ;;  %s335_s30 = smov 96   ;;  %v93_v18 = vlaneseq }
   0xd   :  { %v63_v2 = vld [vmem:[#allocation2 + $0x30] sm:$0xff]  ;;  %52 = vrot.lane.b32.xlu0 %v371_v0, %s334_s3  ;;  %81 = vmatpush.msra.mxu0 %v64_v1  ;;  %v62_v3 = vld [vmem:[#allocation2 + $0x28] sm:$0xff]  ;;  %v61_v4 = vld [vmem:[#allocation2 + $0x20] sm:$0xff]  ;;  %vm55_vm0 = vcmask 261120   ;;  %vm69_vm1 = vcmask 523264   ;;  %vm236_vm13 = vcmask 785408  }
   0xe   :  { %119 = vrot.lane.b32.xlu1 %v371_v0, %s335_s30  ;;  %v60_v5 = vld [vmem:[#allocation2 + $0x18] sm:$0xff]  ;;  %v59_v6 = vld [vmem:[#allocation2 + $0x10] sm:$0xff]  ;;  %v58_v7 = vld [vmem:[#allocation2 + $0x8] sm:$0xff]  ;;  %v94_v20 = vand.u32 127, %v93_v18 }
   0xf   :  { %82 = vmatpush.msra.mxu0 %v63_v2  ;;  %v57_v8 = vld [vmem:[#allocation2] sm:$0xff]  ;;  %v152_v40 = vld [vmem:[#allocation2 + $0x78] sm:$0xff]  ;;  %v151_v41 = vld [vmem:[#allocation2 + $0x70] sm:$0xff] }
  0x10   :  { %v49_v9 = vld [vmem:[%s409_s0] sm:$0xff]  ;;  %vm95_vm2 = vcmp.ge.s32.totalorder %v94_v20, 64  ;;  %vm96_vm3 = vcmp.lt.s32.totalorder %v94_v20, 96  ;;  %s336_s0 = smov 64   ;;  %169 = vmatpush.msra.mxu1 %v152_v40  ;;  %v150_v42 = vld [vmem:[#allocation2 + $0x68] sm:$0xff]  ;;  %v148_v44 = vld [vmem:[#allocation2 + $0x58] sm:$0xff] }
  0x11   :  { %83 = vmatpush.msra.mxu0 %v62_v3  ;;  %v258_v12 = vld [vmem:[#allocation4] ss:$0 sm:$0xff]  ;;  %vm381_vm5 = vmand %vm95_vm2, %vm96_vm3  ;;  %v147_v45 = vld [vmem:[#allocation2 + $0x50] sm:$0xff] }
  0x12   :  { %170 = vmatpush.msra.mxu1 %v151_v41  ;;  %v149_v43 = vld [vmem:[#allocation2 + $0x60] sm:$0xff]  ;;  %v146_v46 = vld [vmem:[#allocation2 + $0x48] sm:$0xff] }
  0x13   :  { %84 = vmatpush.msra.mxu0 %v61_v4  ;;  %v145_v49 = vld [vmem:[#allocation2 + $0x40] sm:$0xff] }
  0x14   :  { %171 = vmatpush.msra.mxu1 %v150_v42  ;;  %v259_v52 = vld [vmem:[#allocation4 + $0x1] ss:$0 sm:$0xff] }
  0x15   :  { %85 = vmatpush.msra.mxu0 %v60_v5 }
  0x16   :  { %172 = vmatpush.msra.mxu1 %v149_v43 }
  0x17   :  { %86 = vmatpush.msra.mxu0 %v59_v6 }
  0x18   :  { %173 = vmatpush.msra.mxu1 %v148_v44 }
  0x19   :  { %87 = vmatpush.msra.mxu0 %v58_v7 }
  0x1a   :  { %174 = vmatpush.msra.mxu1 %v147_v45 }
  0x1b   :  { %88 = vmatpush.msra.mxu0 %v57_v8 }
  0x1c   :  { %175 = vmatpush.msra.mxu1 %v146_v46 }
  0x1e   :  { %176 = vmatpush.msra.mxu1 %v145_v49 }
  0x7f   :  { %v53_v10 = vpop.permute.xlu0 %52 }
  0x80   :  { %v56_v11 = vsel %vm55_vm0, %v49_v9, %v53_v10  ;;  %v120_v35 = vpop.permute.xlu1 %119 }
  0x81   :  { %245 = vmatmul.msk.f32.vlgmr.msra.gmra.mxu0 %vm69_vm1, %v56_v11 }
  0xfe   :  { %v90_v13 = vpop.f32.mrf.mxu0 }
  0xff   :  { %v91_v14 = vadd.f32 %v258_v12, %v90_v13 }
 0x101   :  { %v246_v15 = vmul.f32 -1.442695, %v91_v14 }
 0x103   :  { %260 = vpow2.f32 %v246_v15 }
 0x109   :  { %v261_v16 = vpop.eup %260 }
 0x10a   :  { %v102_v17 = vadd.f32 1.0, %v261_v16 }
 0x10c   :  { %262 = vrcp.f32 %v102_v17  ;;  %v114_v23 = vand.u32 2147483648, %v102_v17  ;;  %v112_v25 = vand.u32 2147483647, %v102_v17  ;;  %vm108_vm6 = vweird.f32 %v102_v17 }
 0x10d   :  { %264 = vtanh.f32 %v91_v14 }
 0x10e   :  { %v115_v28 = vor.u32 1.1754944e-38, %v114_v23  ;;  %vm113_vm8 = vcmp.eq.f32.partialorder %v112_v25, 8.507059e+37 }
 0x112   :  { %v263_v19 = vpop.eup %262 }
 0x113   :  { %v104_v21 = vmul.f32 %v263_v19, %v102_v17  ;;  %vm109_vm4 = vweird.f32 %v263_v19  ;;  %v265_v30 = vpop.eup %264 }
 0x114   :  { %vm110_vm7 = vmor %vm108_vm6, %vm109_vm4 }
 0x115   :  { %v105_v22 = vsub.f32 1.0, %v104_v21 }
 0x117   :  { %v106_v24 = vmul.f32 %v263_v19, %v105_v22 }
 0x119   :  { %v107_v27 = vadd.f32 %v263_v19, %v106_v24 }
 0x11b   :  { %v111_v29 = vsel %vm110_vm7, %v263_v19, %v107_v27 }
 0x11c   :  { %v116_v31 = vsel %vm113_vm8, %v115_v28, %v111_v29 }
 0x11d   :  { %v118_v32 = vsel %vm381_vm5, %v265_v30, %v116_v31 }
 0x11e   :  { %124 = vrot.lane.b32.xlu0 %v118_v32, %s336_s0  ;;  %v122_v36 = vmul.f32 %v120_v35, %v118_v32 }
 0x190   :  { %v125_v33 = vpop.permute.xlu0 %124 }
 0x191   :  { %v127_v34 = vmul.f32 %v125_v33, %v118_v32 }
 0x193   :  { %129 = vrot.lane.b32.xlu1 %v127_v34, %s334_s3 }
 0x19b   :  { %202 = vrot.lane.b32.xlu1 %v371_v0, %s336_s0 }
 0x205   :  { %v130_v37 = vpop.permute.xlu1 %129 }
 0x206   :  { %v132_v38 = vadd.f32 %v130_v37, %v122_v36 }
 0x208   :  { %266 = vtanh.f32 %v132_v38 }
 0x20d   :  { %v203_v8 = vpop.permute.xlu1 %202 }
 0x20e   :  { %v267_v39 = vpop.eup %266 }
 0x20f   :  { %135 = vrot.lane.b32.xlu2 %v267_v39, %s336_s0 }
 0x269   :  { %v136_v47 = vpop.permute.xlu2 %135 }
 0x26a   :  { %v138_v48 = vmul.f32 %v136_v47, %v118_v32 }
 0x26c   :  { %140 = vrot.lane.b32.xlu2 %v138_v48, %s334_s3 }
 0x2c6   :  { %v141_v50 = vpop.permute.xlu2 %140 }
 0x2c7   :  { %v143_v51 = vsel %vm55_vm0, %v141_v50, %v371_v0 }
 0x2c8   :  { %247 = vmatmul.msk.f32.vlgmr.msra.gmra.mxu1 %vm69_vm1, %v143_v51 }
 0x345   :  { %v178_v53 = vpop.f32.mrf.mxu1 }
 0x346   :  { %v179_v54 = vadd.f32 %v259_v52, %v178_v53 }
 0x348   :  { %v248_v55 = vmul.f32 -1.442695, %v179_v54 }
 0x34a   :  { %268 = vpow2.f32 %v248_v55 }
 0x350   :  { %v269_v56 = vpop.eup %268 }
 0x351   :  { %v185_v57 = vadd.f32 1.0, %v269_v56 }
 0x353   :  { %270 = vrcp.f32 %v185_v57  ;;  %v197_v61 = vand.u32 2147483648, %v185_v57  ;;  %v195_v63 = vand.u32 2147483647, %v185_v57  ;;  %vm191_vm10 = vweird.f32 %v185_v57 }
 0x354   :  { %272 = vtanh.f32 %v179_v54 }
 0x355   :  { %v198_v0 = vor.u32 1.1754944e-38, %v197_v61  ;;  %vm196_vm12 = vcmp.eq.f32.partialorder %v195_v63, 8.507059e+37 }
 0x359   :  { %v271_v58 = vpop.eup %270 }
 0x35a   :  { %v187_v59 = vmul.f32 %v271_v58, %v185_v57  ;;  %vm192_vm9 = vweird.f32 %v271_v58  ;;  %v273_v3 = vpop.eup %272 }
 0x35b   :  { %vm193_vm11 = vmor %vm191_vm10, %vm192_vm9 }
 0x35c   :  { %v188_v60 = vsub.f32 1.0, %v187_v59 }
 0x35e   :  { %v189_v62 = vmul.f32 %v271_v58, %v188_v60 }
 0x360   :  { %v190_v1 = vadd.f32 %v271_v58, %v189_v62 }
 0x362   :  { %v194_v2 = vsel %vm193_vm11, %v271_v58, %v190_v1 }
 0x363   :  { %v199_v4 = vsel %vm196_vm12, %v198_v0, %v194_v2 }
 0x364   :  { %v201_v5 = vsel %vm381_vm5, %v273_v3, %v199_v4 }
 0x365   :  { %207 = vrot.lane.b32.xlu0 %v201_v5, %s336_s0  ;;  %v205_v9 = vmul.f32 %v203_v8, %v201_v5 }
 0x3d7   :  { %v208_v6 = vpop.permute.xlu0 %207 }
 0x3d8   :  { %v210_v7 = vmul.f32 %v208_v6, %v201_v5 }
 0x3da   :  { %212 = vrot.lane.b32.xlu2 %v210_v7, %s334_s3 }
 0x3e2   :  { %227 = vrot.lane.b32.xlu2 %v132_v38, %s334_s3 }
 0x434   :  { %v213_v10 = vpop.permute.xlu2 %212 }
 0x435   :  { %v215_v11 = vadd.f32 %v213_v10, %v205_v9 }
 0x437   :  { %274 = vtanh.f32 %v215_v11 }
 0x43c   :  { %v228_v16 = vpop.permute.xlu2 %227 }
 0x43d   :  { %v275_v12 = vpop.eup %274 }
 0x43e   :  { %218 = vrot.lane.b32.xlu0 %v275_v12, %s336_s0 }
 0x446   :  { %231 = vrot.lane.b32.xlu0 %v215_v11, %s336_s0 }
 0x4b0   :  { %v219_v13 = vpop.permute.xlu0 %218 }
 0x4b1   :  { %v221_v14 = vmul.f32 %v219_v13, %v201_v5 }
 0x4b3   :  { %223 = vrot.lane.b32.xlu1 %v221_v14, %s336_s0 }
 0x4b8   :  { %v232_v18 = vpop.permute.xlu0 %231 }
 0x525   :  { %v224_v15 = vpop.permute.xlu1 %223 }
 0x526   :  { %v234_v17 = vsel %vm55_vm0, %v141_v50, %v224_v15 }
 0x527   :  { %v235_v19 = vsel %vm69_vm1, %v234_v17, %v228_v16 }
 0x528   :  { %v237_v20 = vsel %vm236_vm13, %v235_v19, %v232_v18 }
 0x529   :  { %238 = vst [vmem:[%s413_s4] sm:$0xff] %v237_v20 }
 0x52a   :  { %243 = vsyncpa [#allocation3], 1 }
 0x52b   :  { %244 = vsyncpa [#allocation5], 1 }

</bundles_post_ra>
